<compile_context>
chip_gen: v5e
topology: v5e:2x2
jax: 0.10.0
libtpu: 0.0.40
codegen_flags: <defaults>
</compile_context>

<pallas_src>
import functools
import math

import jax
import jax.numpy as jnp
from jax import lax
from jax.experimental import pallas as pl
from jax.experimental.pallas import tpu as pltpu

# ---------------- small Mixtral-like config ----------------
BATCH = 2
SEQ = 8
HIDDEN = 128
NUM_HEADS = 4
NUM_KV_HEADS = 2
HEAD_DIM = HIDDEN // NUM_HEADS            # 32
Q_DIM = NUM_HEADS * HEAD_DIM              # 128
KV_DIM = NUM_KV_HEADS * HEAD_DIM          # 64
QKV_OUT = Q_DIM + 2 * KV_DIM              # 256
SLIDING_WINDOW = -1                       # config.sliding_window is None -> -1 (disabled)
ROPE_BASE = 10000.0


# ---------------- fused attention kernel (single invocation) ----------------
def _mixtral_attn_kernel(x_ref, wqkv_ref, wo_ref, cos_ref, sin_ref, bias_ref, o_ref,
                         *, num_heads, num_kv_heads, head_dim, tokens):
    """Fused qkv-proj + RoPE + GQA causal attention + o_proj over all B*S tokens."""
    D = head_dim
    half = D // 2
    q_dim = num_heads * D
    kv_dim = num_kv_heads * D
    n = tokens                                                   # B*S rows

    # --- fused qkv projection: bf16 MXU inputs, f32 accumulation -------------
    qkv = jnp.dot(x_ref[...], wqkv_ref[...],
                  preferred_element_type=jnp.float32)            # (n, QKV) f32

    # --- head-major row stacking (done ONCE, outside any loop) ---------------
    #   qk: rows [h*n:(h+1)*n] = q head h, rows [q..] = k head kh   -> (96, D)
    #   v : rows [kh*n:(kh+1)*n] = v head kh                        -> (32, D)
    qk = jnp.concatenate(
        [qkv[:, h * D:(h + 1) * D] for h in range(num_heads)]
        + [qkv[:, q_dim + kh * D: q_dim + (kh + 1) * D]
           for kh in range(num_kv_heads)], axis=0)
    v = jnp.concatenate(
        [qkv[:, q_dim + kv_dim + kh * D: q_dim + kv_dim + (kh + 1) * D]
         for kh in range(num_kv_heads)], axis=0).astype(jnp.bfloat16)

    # --- RoPE (rotate-half) on q & k together; 1/sqrt(D) is pre-folded into the
    #     q rows of cos/sin tables -------------------------------------------
    rot = jnp.concatenate([-qk[:, half:], qk[:, :half]], axis=-1)
    qk = qk * cos_ref[...] + rot * sin_ref[...]
    q = qk[:num_heads * n].astype(jnp.bfloat16)                  # (64, D)
    k = qk[num_heads * n:].astype(jnp.bfloat16)                  # (32, D)

    # --- ALL (head, batch) score blocks in one matmul; the additive bias carries
    #     GQA-group / batch / causal (+ optional sliding-window) masking ------
    s = lax.dot_general(q, k, (((1,), (1,)), ((), ())),
                        preferred_element_type=jnp.float32) + bias_ref[...]   # (64, 32)
    m = jnp.max(s, axis=-1, keepdims=True)
    p = jnp.exp(s - m)
    p = p * pl.reciprocal(jnp.sum(p, axis=-1, keepdims=True), approx=True)     # EUP recip
    ctx = jnp.dot(p.astype(jnp.bfloat16), v,
                  preferred_element_type=jnp.float32)            # (64, D)

    # --- unstack heads back to lanes -> (n, Q_DIM), single K=128 o_proj ------
    ctx = jnp.concatenate([ctx[h * n:(h + 1) * n, :] for h in range(num_heads)],
                          axis=-1)                               # (n, 128)
    o_ref[...] = jnp.dot(ctx.astype(jnp.bfloat16), wo_ref[...],
                         preferred_element_type=jnp.float32).astype(o_ref.dtype)


# ---------------- wrapper-side tables ----------------
def _rope_tables(cos, sin, scale, batch):
    """(96, D) cos/sin tables for the head-major [q heads | k heads] row stacking.

    Row r = h*(B*S) + b*S + s depends only on position s, so the (S, D) tables are
    tiled per (head, batch). The attention scale is folded into the q rows.
    """
    q_tiles = NUM_HEADS * batch
    k_tiles = NUM_KV_HEADS * batch
    cos_t = jnp.concatenate([jnp.tile(cos * scale, (q_tiles, 1)),
                             jnp.tile(cos, (k_tiles, 1))], axis=0)
    sin_t = jnp.concatenate([jnp.tile(sin * scale, (q_tiles, 1)),
                             jnp.tile(sin, (k_tiles, 1))], axis=0)
    return cos_t.astype(jnp.float32), sin_t.astype(jnp.float32)


def _attn_bias(batch, seq, num_heads, num_kv_heads, window):
    """(num_heads*B*S, num_kv_heads*B*S) additive bias: 0 where the q row may attend
    to the k column (same GQA group, same batch, causal, within window), -1e30 else."""
    group = num_heads // num_kv_heads
    bs = batch * seq
    r = jnp.arange(num_heads * bs)
    c = jnp.arange(num_kv_heads * bs)
    rh, rr = r // bs, r % bs
    rb, rs = rr // seq, rr % seq
    ch, cr = c // bs, c % bs
    cb, cs = cr // seq, cr % seq
    ok = ((ch[None, :] == (rh // group)[:, None])
          & (cb[None, :] == rb[:, None])
          & (cs[None, :] <= rs[:, None]))
    if window > 0:
        ok = ok & ((rs[:, None] - cs[None, :]) < window)
    return jnp.where(ok, 0.0, -1e30).astype(jnp.float32)


def mixtral_attention(weights, hidden_states, rotary_pos_emb, *,
                      window=SLIDING_WINDOW):
    """MixtralAttention.forward (prefill): qkv_proj -> RoPE -> causal GQA attn -> o_proj."""
    # TODO(synk): lmdeploy's paged KV-cache write / decode path (past_key_value,
    # attn_metadata, k/v scales-zeros) and the TP all-reduce of o_proj are not
    # implemented; this is the prefill-only attention math.
    B, S, H = hidden_states.shape
    cos, sin = rotary_pos_emb
    scale = 1.0 / math.sqrt(HEAD_DIM)
    cos_t, sin_t = _rope_tables(cos, sin, scale, B)
    bias = _attn_bias(B, S, NUM_HEADS, NUM_KV_HEADS, window)
    x = hidden_states.reshape(B * S, H).astype(jnp.bfloat16)     # bf16 DMA, lane-dense

    kernel = functools.partial(
        _mixtral_attn_kernel, num_heads=NUM_HEADS, num_kv_heads=NUM_KV_HEADS,
        head_dim=HEAD_DIM, tokens=B * S)

    vmem = pl.BlockSpec(memory_space=pltpu.MemorySpace.VMEM)
    out = pl.pallas_call(
        kernel,
        out_shape=jax.ShapeDtypeStruct((B * S, H), jnp.float32),
        in_specs=[vmem] * 6,
        out_specs=vmem,
        compiler_params=pltpu.CompilerParams(vmem_limit_bytes=64 << 20),
    )(x, weights["w_qkv_t"], weights["w_o_t"], cos_t, sin_t, bias)
    return out.reshape(B, S, H)


# ---------------- parameters & rotary embedding ----------------
def init_params(key):
    k1, k2 = jax.random.split(key)
    # torch nn.Linear layout: (out_features, in_features), bias=False
    w_qkv = 0.02 * jax.random.normal(k1, (QKV_OUT, HIDDEN), jnp.float32)
    w_o = 0.02 * jax.random.normal(k2, (HIDDEN, Q_DIM), jnp.float32)
    return {"w_qkv": w_qkv, "w_o": w_o}


def prepare_weights(params):
    # Pre-transpose torch-layout (N, K) weights to (K, N) once and store bf16;
    # MXU accumulation stays f32 inside the kernel.
    return {"w_qkv_t": jnp.asarray(params["w_qkv"].T, jnp.bfloat16),
            "w_o_t": jnp.asarray(params["w_o"].T, jnp.bfloat16)}


def rotary_embedding(seq_len, dim, base=ROPE_BASE):
    inv_freq = 1.0 / (base ** (jnp.arange(0, dim, 2, dtype=jnp.float32) / dim))
    t = jnp.arange(seq_len, dtype=jnp.float32)
    freqs = jnp.outer(t, inv_freq)                     # (S, D/2)
    emb = jnp.concatenate([freqs, freqs], axis=-1)     # (S, D)
    return jnp.cos(emb), jnp.sin(emb)


# ---------------- pure-JAX reference (same bf16 weights/inputs, f32 math) ----------------
def reference_attention(weights, hidden_states, rotary_pos_emb, *,
                        window=SLIDING_WINDOW):
    B, S, H = hidden_states.shape
    D = HEAD_DIM
    cos, sin = rotary_pos_emb
    wqkv = weights["w_qkv_t"].astype(jnp.float32)
    wo = weights["w_o_t"].astype(jnp.float32)
    x = hidden_states.reshape(B * S, H).astype(jnp.bfloat16).astype(jnp.float32)
    qkv = jnp.dot(x, wqkv, precision="highest")
    q = qkv[:, :Q_DIM].reshape(B, S, NUM_HEADS, D)
    k = qkv[:, Q_DIM:Q_DIM + KV_DIM].reshape(B, S, NUM_KV_HEADS, D)
    v = qkv[:, Q_DIM + KV_DIM:].reshape(B, S, NUM_KV_HEADS, D)

    def rope(t):
        t1, t2 = t[..., :D // 2], t[..., D // 2:]
        rot = jnp.concatenate([-t2, t1], axis=-1)
        return t * cos[None, :, None, :] + rot * sin[None, :, None, :]

    q, k = rope(q), rope(k)
    group = NUM_HEADS // NUM_KV_HEADS
    k = jnp.repeat(k, group, axis=2)
    v = jnp.repeat(v, group, axis=2)
    s = jnp.einsum("bqhd,bkhd->bhqk", q, k, precision="highest") / math.sqrt(D)
    i = jnp.arange(S)[:, None]
    j = jnp.arange(S)[None, :]
    mask = j <= i
    if window > 0:
        mask = mask & ((i - j) < window)
    s = jnp.where(mask[None, None], s, -1e30)
    p = jax.nn.softmax(s, axis=-1)
    ctx = jnp.einsum("bhqk,bkhd->bqhd", p, v, precision="highest")
    ctx = ctx.reshape(B * S, Q_DIM)
    return jnp.dot(ctx, wo, precision="highest").reshape(B, S, H)


if __name__ == "__main__":
    key = jax.random.PRNGKey(0)
    pkey, xkey = jax.random.split(key)
    params = init_params(pkey)
    weights = prepare_weights(params)
    hidden_states = jax.random.normal(xkey, (BATCH, SEQ, HIDDEN), dtype=jnp.float32)
    cos, sin = rotary_embedding(SEQ, HEAD_DIM)

    out = mixtral_attention(weights, hidden_states, (cos, sin))
    jax.block_until_ready(out)

    assert out.shape == (BATCH, SEQ, HIDDEN)
    assert bool(jnp.all(jnp.isfinite(out)))

    ref = reference_attention(weights, hidden_states, (cos, sin))
    max_err = float(jnp.max(jnp.abs(out - ref)))
    assert max_err < 2e-2, f"max abs err {max_err}"
    print("KERNEL_OK")
</pallas_src>

<mosaic_0001>
module attributes {stable_mosaic.version = 11 : i64} {
  func.func @_mixtral_attn_kernel(%arg0: memref<16x128xbf16, #tpu.memory_space<vmem>>, %arg1: memref<128x256xbf16, #tpu.memory_space<vmem>>, %arg2: memref<128x128xbf16, #tpu.memory_space<vmem>>, %arg3: memref<96x32xf32, #tpu.memory_space<vmem>>, %arg4: memref<96x32xf32, #tpu.memory_space<vmem>>, %arg5: memref<64x32xf32, #tpu.memory_space<vmem>>, %arg6: memref<16x128xf32, #tpu.memory_space<vmem>>) attributes {dimension_semantics = [], scalar_prefetch = 0 : i64, scratch_operands = 0 : i64, tpu.core_type = #tpu.core_type<tc>} {
    %c0 = arith.constant 0 : index
    %c0_0 = arith.constant 0 : index
    %0 = vector.load %arg0[%c0, %c0_0] : memref<16x128xbf16, #tpu.memory_space<vmem>>, vector<16x128xbf16>
    %c0_1 = arith.constant 0 : index
    %c0_2 = arith.constant 0 : index
    %1 = vector.load %arg1[%c0_1, %c0_2] : memref<128x256xbf16, #tpu.memory_space<vmem>>, vector<128x256xbf16>
    %cst = arith.constant dense<0.000000e+00> : vector<16x256xf32>
    %2 = tpu.matmul %0, %1, %cst {dimension_numbers = #tpu.dot_dimension_numbers<[1], [0], [0], [1], [0, 0, 1, 1], [], []>} : vector<16x128xbf16>, vector<128x256xbf16>, vector<16x256xf32> -> vector<16x256xf32>
    %3 = vector.extract_strided_slice %2 {offsets = [0, 0], sizes = [16, 32], strides = [1, 1]} : vector<16x256xf32> to vector<16x32xf32>
    %4 = vector.extract_strided_slice %2 {offsets = [0, 32], sizes = [16, 32], strides = [1, 1]} : vector<16x256xf32> to vector<16x32xf32>
    %5 = vector.extract_strided_slice %2 {offsets = [0, 64], sizes = [16, 32], strides = [1, 1]} : vector<16x256xf32> to vector<16x32xf32>
    %6 = vector.extract_strided_slice %2 {offsets = [0, 96], sizes = [16, 32], strides = [1, 1]} : vector<16x256xf32> to vector<16x32xf32>
    %7 = vector.extract_strided_slice %2 {offsets = [0, 128], sizes = [16, 32], strides = [1, 1]} : vector<16x256xf32> to vector<16x32xf32>
    %8 = vector.extract_strided_slice %2 {offsets = [0, 160], sizes = [16, 32], strides = [1, 1]} : vector<16x256xf32> to vector<16x32xf32>
    %9 = tpu.concatenate %3, %4, %5, %6, %7, %8 in 0 : vector<16x32xf32>, vector<16x32xf32>, vector<16x32xf32>, vector<16x32xf32>, vector<16x32xf32>, vector<16x32xf32> -> vector<96x32xf32>
    %10 = vector.extract_strided_slice %2 {offsets = [0, 192], sizes = [16, 32], strides = [1, 1]} : vector<16x256xf32> to vector<16x32xf32>
    %11 = vector.extract_strided_slice %2 {offsets = [0, 224], sizes = [16, 32], strides = [1, 1]} : vector<16x256xf32> to vector<16x32xf32>
    %12 = tpu.concatenate %10, %11 in 0 : vector<16x32xf32>, vector<16x32xf32> -> vector<32x32xf32>
    %13 = arith.truncf %12 : vector<32x32xf32> to vector<32x32xbf16>
    %14 = vector.extract_strided_slice %9 {offsets = [0, 16], sizes = [96, 16], strides = [1, 1]} : vector<96x32xf32> to vector<96x16xf32>
    %cst_3 = arith.constant 0.000000e+00 : f32
    %15 = vector.broadcast %cst_3 : f32 to vector<96x16xf32>
    %16 = arith.subf %15, %14 : vector<96x16xf32>
    %17 = vector.extract_strided_slice %9 {offsets = [0, 0], sizes = [96, 16], strides = [1, 1]} : vector<96x32xf32> to vector<96x16xf32>
    %18 = tpu.concatenate %16, %17 in 1 : vector<96x16xf32>, vector<96x16xf32> -> vector<96x32xf32>
    %c0_4 = arith.constant 0 : index
    %c0_5 = arith.constant 0 : index
    %19 = vector.load %arg3[%c0_4, %c0_5] : memref<96x32xf32, #tpu.memory_space<vmem>>, vector<96x32xf32>
    %20 = arith.mulf %9, %19 : vector<96x32xf32>
    %c0_6 = arith.constant 0 : index
    %c0_7 = arith.constant 0 : index
    %21 = vector.load %arg4[%c0_6, %c0_7] : memref<96x32xf32, #tpu.memory_space<vmem>>, vector<96x32xf32>
    %22 = arith.mulf %18, %21 : vector<96x32xf32>
    %23 = arith.addf %20, %22 : vector<96x32xf32>
    %24 = vector.extract_strided_slice %23 {offsets = [0, 0], sizes = [64, 32], strides = [1, 1]} : vector<96x32xf32> to vector<64x32xf32>
    %25 = arith.truncf %24 : vector<64x32xf32> to vector<64x32xbf16>
    %26 = vector.extract_strided_slice %23 {offsets = [64, 0], sizes = [32, 32], strides = [1, 1]} : vector<96x32xf32> to vector<32x32xf32>
    %27 = arith.truncf %26 : vector<32x32xf32> to vector<32x32xbf16>
    %cst_8 = arith.constant dense<0.000000e+00> : vector<64x32xf32>
    %28 = tpu.matmul %25, %27, %cst_8 {dimension_numbers = #tpu.dot_dimension_numbers<[1], [1], [0], [0], [0, 0, 1, 0], [], []>} : vector<64x32xbf16>, vector<32x32xbf16>, vector<64x32xf32> -> vector<64x32xf32>
    %c0_9 = arith.constant 0 : index
    %c0_10 = arith.constant 0 : index
    %29 = vector.load %arg5[%c0_9, %c0_10] : memref<64x32xf32, #tpu.memory_space<vmem>>, vector<64x32xf32>
    %30 = arith.addf %28, %29 : vector<64x32xf32>
    %cst_11 = arith.constant dense<0xFF800000> : vector<64xf32>
    %31 = vector.multi_reduction <maximumf>, %30, %cst_11 [1] : vector<64x32xf32> to vector<64xf32>
    %32 = vector.shape_cast %31 : vector<64xf32> to vector<64x1xf32>
    %33 = vector.broadcast %32 : vector<64x1xf32> to vector<64x32xf32>
    %34 = arith.subf %30, %33 : vector<64x32xf32>
    %35 = math.exp %34 : vector<64x32xf32>
    %cst_12 = arith.constant dense<0.000000e+00> : vector<64xf32>
    %36 = vector.multi_reduction <add>, %35, %cst_12 [1] : vector<64x32xf32> to vector<64xf32>
    %37 = vector.shape_cast %36 : vector<64xf32> to vector<64x1xf32>
    %38 = tpu.reciprocal %37 {approx = true} : vector<64x1xf32> -> vector<64x1xf32>
    %39 = vector.broadcast %38 : vector<64x1xf32> to vector<64x32xf32>
    %40 = arith.mulf %35, %39 : vector<64x32xf32>
    %41 = arith.truncf %40 : vector<64x32xf32> to vector<64x32xbf16>
    %cst_13 = arith.constant dense<0.000000e+00> : vector<64x32xf32>
    %42 = tpu.matmul %41, %13, %cst_13 {dimension_numbers = #tpu.dot_dimension_numbers<[1], [0], [0], [1], [0, 0, 1, 1], [], []>} : vector<64x32xbf16>, vector<32x32xbf16>, vector<64x32xf32> -> vector<64x32xf32>
    %43 = vector.extract_strided_slice %42 {offsets = [0, 0], sizes = [16, 32], strides = [1, 1]} : vector<64x32xf32> to vector<16x32xf32>
    %44 = vector.extract_strided_slice %42 {offsets = [16, 0], sizes = [16, 32], strides = [1, 1]} : vector<64x32xf32> to vector<16x32xf32>
    %45 = vector.extract_strided_slice %42 {offsets = [32, 0], sizes = [16, 32], strides = [1, 1]} : vector<64x32xf32> to vector<16x32xf32>
    %46 = vector.extract_strided_slice %42 {offsets = [48, 0], sizes = [16, 32], strides = [1, 1]} : vector<64x32xf32> to vector<16x32xf32>
    %47 = tpu.concatenate %43, %44, %45, %46 in 1 : vector<16x32xf32>, vector<16x32xf32>, vector<16x32xf32>, vector<16x32xf32> -> vector<16x128xf32>
    %48 = arith.truncf %47 : vector<16x128xf32> to vector<16x128xbf16>
    %c0_14 = arith.constant 0 : index
    %c0_15 = arith.constant 0 : index
    %49 = vector.load %arg2[%c0_14, %c0_15] : memref<128x128xbf16, #tpu.memory_space<vmem>>, vector<128x128xbf16>
    %cst_16 = arith.constant dense<0.000000e+00> : vector<16x128xf32>
    %50 = tpu.matmul %48, %49, %cst_16 {dimension_numbers = #tpu.dot_dimension_numbers<[1], [0], [0], [1], [0, 0, 1, 1], [], []>} : vector<16x128xbf16>, vector<128x128xbf16>, vector<16x128xf32> -> vector<16x128xf32>
    %c0_17 = arith.constant 0 : index
    %c0_18 = arith.constant 0 : index
    %51 = vector.load %arg6[%c0_17, %c0_18] : memref<16x128xf32, #tpu.memory_space<vmem>>, vector<16x128xf32>
    tpu.vector_store %arg6[%c0_17, %c0_18], %50 {strides = array<i32>} : memref<16x128xf32, #tpu.memory_space<vmem>>, vector<16x128xf32>,
    return
  }
}

</mosaic_0001>

<bundles_post_ra>
// kernel: tpu_custom_call.1
= control target key start
LH: loop header
LB: loop body
LE: loop exit
PB: predicated region body
PF: predicated region fallthrough
CT: control target
= control target key end

     0   :  { %s1320_s0 = inlined_call_operand.vmem [shape: bf16[16,128], index: 0, kind: input, shape index: {}]   ;;  %s1321_s1 = inlined_call_operand.vmem [shape: bf16[128,256], index: 1, kind: input, shape index: {}]   ;;  %s1322_s2 = inlined_call_operand.vmem [shape: bf16[128,128], index: 2, kind: input, shape index: {}]   ;;  %s1323_s3 = inlined_call_operand.vmem [shape: f32[96,32], index: 3, kind: input, shape index: {}]   ;;  %s1324_s4 = inlined_call_operand.vmem [shape: f32[96,32], index: 4, kind: input, shape index: {}]   ;;  %s1325_s5 = inlined_call_operand.vmem [shape: f32[64,32], index: 5, kind: input, shape index: {}]   ;;  %s1326_s6 = inlined_call_operand.hbm [shape: f32[16,128], index: 6, kind: output, shape index: {}]  }
   0x1   :  { %v752_v0 = vld [vmem:[%s1321_s1 + $0x70] sm:$0xf]  ;;  %v814_v1 = vld [vmem:[%s1321_s1 + $0x74] sm:$0xf0]  ;;  %v813_v2 = vld [vmem:[%s1321_s1 + $0x74] sm:$0xf] }
   0x2   :  { %v753_v3 = vor.u32 %v814_v1, %v752_v0  ;;  %v754_v4 = vld [vmem:[%s1321_s1 + $0x78] sm:$0xf0]  ;;  %v744_v5 = vld [vmem:[%s1321_s1 + $0x60] sm:$0xf]  ;;  %v812_v6 = vld [vmem:[%s1321_s1 + $0x64] sm:$0xf0] }
   0x3   :  { %v757_v7 = vor.u32 %v813_v2, %v754_v4  ;;  %v811_v8 = vld [vmem:[%s1321_s1 + $0x64] sm:$0xf]  ;;  %v746_v9 = vld [vmem:[%s1321_s1 + $0x68] sm:$0xf0]  ;;  %v745_v10 = vor.u32 %v812_v6, %v744_v5  ;;  %v736_v12 = vld [vmem:[%s1321_s1 + $0x50] sm:$0xf] }
   0x4   :  { %129 = vmatpush.bf16.msra.mxu0 %v753_v3  ;;  %v749_v11 = vor.u32 %v811_v8, %v746_v9  ;;  %v810_v13 = vld [vmem:[%s1321_s1 + $0x54] sm:$0xf0]  ;;  %v809_v14 = vld [vmem:[%s1321_s1 + $0x54] sm:$0xf]  ;;  %v738_v15 = vld [vmem:[%s1321_s1 + $0x58] sm:$0xf0] }
   0x5   :  { %143 = vmatpush.bf16.msra.mxu1 %v757_v7  ;;  %v737_v16 = vor.u32 %v810_v13, %v736_v12  ;;  %v741_v17 = vor.u32 %v809_v14, %v738_v15  ;;  %v728_v18 = vld [vmem:[%s1321_s1 + $0x40] sm:$0xf]  ;;  %v808_v19 = vld [vmem:[%s1321_s1 + $0x44] sm:$0xf0]  ;;  %v807_v20 = vld [vmem:[%s1321_s1 + $0x44] sm:$0xf] }
   0x6   :  { %v730_v21 = vld [vmem:[%s1321_s1 + $0x48] sm:$0xf0]  ;;  %v729_v22 = vor.u32 %v808_v19, %v728_v18 }
   0x8   :  { %130 = vmatpush.bf16.msra.mxu0 %v745_v10 }
   0x9   :  { %144 = vmatpush.bf16.msra.mxu1 %v749_v11 }
   0xc   :  { %131 = vmatpush.bf16.msra.mxu0 %v737_v16 }
   0xd   :  { %11 = vsyncpa [#allocation3], 0  ;;  %145 = vmatpush.bf16.msra.mxu1 %v741_v17  ;;  %v733_v23 = vor.u32 %v807_v20, %v730_v21  ;;  %v720_v24 = vld [vmem:[%s1321_s1 + $0x30] sm:$0xf]  ;;  %v806_v25 = vld [vmem:[%s1321_s1 + $0x34] sm:$0xf0] }
   0xe   :  { %v805_v26 = vld [vmem:[%s1321_s1 + $0x34] sm:$0xf]  ;;  %v722_v27 = vld [vmem:[%s1321_s1 + $0x38] sm:$0xf0]  ;;  %v721_v28 = vor.u32 %v806_v25, %v720_v24  ;;  %v712_v30 = vld [vmem:[%s1321_s1 + $0x20] sm:$0xf] }
   0xf   :  { %v725_v29 = vor.u32 %v805_v26, %v722_v27  ;;  %v804_v31 = vld [vmem:[%s1321_s1 + $0x24] sm:$0xf0]  ;;  %v803_v32 = vld [vmem:[%s1321_s1 + $0x24] sm:$0xf]  ;;  %v714_v33 = vld [vmem:[%s1321_s1 + $0x28] sm:$0xf0] }
  0x10   :  { %132 = vmatpush.bf16.msra.mxu0 %v729_v22  ;;  %v713_v34 = vor.u32 %v804_v31, %v712_v30  ;;  %v717_v35 = vor.u32 %v803_v32, %v714_v33  ;;  %v704_v36 = vld [vmem:[%s1321_s1 + $0x10] sm:$0xf]  ;;  %v802_v37 = vld [vmem:[%s1321_s1 + $0x14] sm:$0xf0]  ;;  %v801_v38 = vld [vmem:[%s1321_s1 + $0x14] sm:$0xf] }
  0x11   :  { %146 = vmatpush.bf16.msra.mxu1 %v733_v23  ;;  %v706_v39 = vld [vmem:[%s1321_s1 + $0x18] sm:$0xf0]  ;;  %v705_v40 = vor.u32 %v802_v37, %v704_v36  ;;  %v696_v42 = vld [vmem:[%s1321_s1] sm:$0xf]  ;;  %v800_v43 = vld [vmem:[%s1321_s1 + $0x4] sm:$0xf0] }
  0x12   :  { %v709_v41 = vor.u32 %v801_v38, %v706_v39  ;;  %v799_v44 = vld [vmem:[%s1321_s1 + $0x4] sm:$0xf]  ;;  %v698_v45 = vld [vmem:[%s1321_s1 + $0x8] sm:$0xf0]  ;;  %v697_v46 = vor.u32 %v800_v43, %v696_v42  ;;  %s904_s15 = smov 96   ;;  %s905_s1 = smov 64  }
  0x13   :  { %v701_v47 = vor.u32 %v799_v44, %v698_v45  ;;  %v798_v48 = vld [vmem:[%s1320_s0] sm:$0xff]  ;;  %s906_s0 = smov 112   ;;  %s907_s16 = smov 16   ;;  %vm283_vm0 = vcmask 130048   ;;  %v330_v12 = vld [vmem:[%s1324_s4 + $0x50] sm:$0xff]  ;;  %v331_v14 = vld [vmem:[%s1324_s4 + $0x58] sm:$0xff] }
  0x14   :  { %133 = vmatpush.bf16.msra.mxu0 %v721_v28  ;;  %s908_s17 = smov 32   ;;  %v306_v15 = vld [vmem:[%s1323_s3 + $0x50] sm:$0xff]  ;;  %v307_v16 = vld [vmem:[%s1323_s3 + $0x58] sm:$0xff]  ;;  %v328_v26 = vld [vmem:[%s1324_s4 + $0x40] sm:$0xff]  ;;  %vm370_vm1 = vcmask 261120   ;;  %vm585_vm2 = vcmask 523264  }
  0x15   :  { %147 = vmatpush.bf16.msra.mxu1 %v725_v29  ;;  %v305_v29 = vld [vmem:[%s1323_s3 + $0x48] sm:$0xff]  ;;  %v304_v32 = vld [vmem:[%s1323_s3 + $0x40] sm:$0xff]  ;;  %vm588_vm3 = vcmask 785408   ;;  %s678_s26 = sshll.u32 %s1326_s6, 4  ;;  %s910_s27 = smov 128   ;;  %s679_s26 = int_to_ptr.hbm [resolvable:$true] %s678_s26 }
  0x16   :  { %v329_v31 = vld [vmem:[%s1324_s4 + $0x48] sm:$0xff]  ;;  %s911_s28 = smov 8  }
  0x17   :  { %v321_v43 = vld [vmem:[%s1324_s4 + $0x8] sm:$0xff] }
  0x18   :  { %134 = vmatpush.bf16.msra.mxu0 %v713_v34 }
  0x19   :  { %148 = vmatpush.bf16.msra.mxu1 %v717_v35 }
  0x1c   :  { %135 = vmatpush.bf16.msra.mxu0 %v705_v40 }
  0x1d   :  { %149 = vmatpush.bf16.msra.mxu1 %v709_v41 }
  0x20   :  { %136 = vmatpush.bf16.msra.mxu0 %v697_v46  ;;  %v297_v46 = vld [vmem:[%s1323_s3 + $0x8] sm:$0xff] }
  0x21   :  { %150 = vmatpush.bf16.msra.mxu1 %v701_v47 }
  0x23   :  { %137 = vmatmul.bf16.vlgmr.msra.gmra.mxu0 %v798_v48 }
  0x24   :  { %151 = vmatmul.bf16.vlgmr.msra.gmra.mxu1 %v798_v48  ;;  %v296_v48 = vld [vmem:[%s1323_s3] sm:$0xff] }
  0xa0   :  { %v1046_v49 = vpop.f32.mrf.mxu0 }
  0xa1   :  { %v1048_v50 = vpop.f32.mrf.mxu1  ;;  %159 = vrot.lane.b32.xlu1 %v1046_v49, %s904_s15  ;;  %165 = vrot.lane.b32.xlu2 %v1046_v49, %s905_s1  ;;  %v187_v62 = vsub.f32 0.0, %v1046_v49 }
  0xa2   :  { %179 = vrot.lane.b32.xlu0 %v1048_v50, %s904_s15  ;;  %v195_v51 = vsub.f32 0.0, %v1048_v50  ;;  %v316_v40 = vmul.f32 %v304_v32, %v1048_v50 }
  0xa8   :  { %v1064_v54 = vpop.f32.mrf.mxu0 }
  0xa9   :  { %v1057_v52 = vpop.f32.mrf.mxu1  ;;  %227 = vrot.lane.b32.xlu1 %v195_v51, %s906_s0  ;;  %v188_v61 = vsub.f32 0.0, %v1064_v54  ;;  %v320_v51 = vld [vmem:[%s1324_s4] sm:$0xff] }
  0xaa   :  { %181 = vrot.lane.b32.xlu0 %v1057_v52, %s904_s15  ;;  %v196_v53 = vsub.f32 0.0, %v1057_v52  ;;  %v317_v38 = vmul.f32 %v305_v29, %v1057_v52  ;;  %v325_v29 = vld [vmem:[%s1324_s4 + $0x28] sm:$0xff] }
  0xac   :  { %229 = vrot.lane.b32.xlu2 %v196_v53, %s906_s0 }
  0xb1   :  { %161 = vrot.lane.b32.xlu1 %v1064_v54, %s904_s15 }
  0xb2   :  { %167 = vrot.lane.b32.xlu0 %v1064_v54, %s905_s1 }
  0xfb   :  { %v1108_v3 = vpop.permute.xlu2 %165 }
  0xfc   :  { %v191_v4 = vsub.f32 0.0, %v1108_v3 }
 0x106   :  { %v230_v7 = vpop.permute.xlu2 %229 }
 0x113   :  { %v1076_v57 = vpop.permute.xlu1 %159 }
 0x114   :  { %v1070_v55 = vpop.permute.xlu0 %179  ;;  %v189_v2 = vsub.f32 0.0, %v1076_v57 }
 0x115   :  { %267 = vrot.lane.b32.xlu0 %v1070_v55, %s907_s16  ;;  %v197_v56 = vsub.f32 0.0, %v1070_v55  ;;  %v318_v22 = vmul.f32 %v306_v15, %v1070_v55  ;;  %v322_v15 = vld [vmem:[%s1324_s4 + $0x10] sm:$0xff] }
 0x117   :  { %231 = vrot.lane.b32.xlu2 %v197_v56, %s906_s0 }
 0x11b   :  { %v228_v63 = vpop.permute.xlu1 %227 }
 0x11c   :  { %v1078_v58 = vpop.permute.xlu0 %181 }
 0x11d   :  { %263 = vrot.lane.b32.xlu0 %v1048_v50, %s907_s16  ;;  %269 = vrot.lane.b32.xlu1 %v1078_v58, %s907_s16  ;;  %v198_v59 = vsub.f32 0.0, %v1078_v58  ;;  %v186_v60 = vpack.c.bf16 %v1078_v58, %v1070_v55  ;;  %v319_v23 = vmul.f32 %v307_v16, %v1078_v58 }
 0x11f   :  { %233 = vrot.lane.b32.xlu2 %v198_v59, %s906_s0 }
 0x123   :  { %v1098_v0 = vpop.permute.xlu1 %161 }
 0x124   :  { %v190_v1 = vsub.f32 0.0, %v1098_v0  ;;  %v1114_v5 = vpop.permute.xlu0 %167 }
 0x125   :  { %265 = vrot.lane.b32.xlu1 %v1057_v52, %s907_s16  ;;  %213 = vrot.lane.b32.xlu0 %v188_v61, %s906_s0  ;;  %v192_v6 = vsub.f32 0.0, %v1114_v5 }
 0x127   :  { %211 = vrot.lane.b32.xlu2 %v187_v62, %s906_s0 }
 0x12d   :  { %247 = vrot.lane.b32.xlu1 %v1046_v49, %s907_s16  ;;  %171 = vrot.lane.b32.xlu0 %v1046_v49, %s908_s17 }
 0x12f   :  { %249 = vrot.lane.b32.xlu2 %v1064_v54, %s907_s16 }
 0x135   :  { %173 = vrot.lane.b32.xlu1 %v1064_v54, %s908_s17  ;;  %217 = vrot.lane.b32.xlu0 %v190_v1, %s906_s0  ;;  %v309_v1 = vmul.f32 %v297_v46, %v1064_v54 }
 0x137   :  { %215 = vrot.lane.b32.xlu2 %v189_v2, %s906_s0  ;;  %v308_v2 = vmul.f32 %v296_v48, %v1046_v49  ;;  %v323_v49 = vld [vmem:[%s1324_s4 + $0x18] sm:$0xff] }
 0x13d   :  { %251 = vrot.lane.b32.xlu1 %v1076_v57, %s907_s16  ;;  %219 = vrot.lane.b32.xlu0 %v191_v4, %s906_s0 }
 0x13f   :  { %253 = vrot.lane.b32.xlu2 %v1098_v0, %s907_s16 }
 0x145   :  { %221 = vrot.lane.b32.xlu1 %v192_v6, %s906_s0  ;;  %257 = vrot.lane.b32.xlu0 %v1114_v5, %s907_s16 }
 0x147   :  { %255 = vrot.lane.b32.xlu2 %v1108_v3, %s907_s16 }
 0x171   :  { %v232_v8 = vpop.permute.xlu2 %231 }
 0x179   :  { %v234_v9 = vpop.permute.xlu2 %233 }
 0x181   :  { %v212_v11 = vpop.permute.xlu2 %211 }
 0x187   :  { %v268_v10 = vpop.permute.xlu0 %267 }
 0x188   :  { %v294_v13 = vsel %vm283_vm0, %v232_v8, %v268_v10 }
 0x189   :  { %v342_v17 = vmul.f32 %v330_v12, %v294_v13  ;;  %v250_v30 = vpop.permute.xlu2 %249  ;;  %v298_v13 = vld [vmem:[%s1323_s3 + $0x10] sm:$0xff] }
 0x18b   :  { %v354_v24 = vadd.f32 %v342_v17, %v318_v22 }
 0x18f   :  { %v264_v18 = vpop.permute.xlu0 %263  ;;  %v270_v19 = vpop.permute.xlu1 %269 }
 0x190   :  { %v295_v20 = vsel %vm283_vm0, %v234_v9, %v270_v19  ;;  %v292_v27 = vsel %vm283_vm0, %v228_v63, %v264_v18 }
 0x191   :  { %v343_v21 = vmul.f32 %v331_v14, %v295_v20  ;;  %v340_v33 = vmul.f32 %v328_v26, %v292_v27  ;;  %v216_v47 = vpop.permute.xlu2 %215  ;;  %v299_v14 = vld [vmem:[%s1323_s3 + $0x18] sm:$0xff]  ;;  %v310_v20 = vmul.f32 %v298_v13, %v1076_v57  ;;  %v301_v57 = vld [vmem:[%s1323_s3 + $0x28] sm:$0xff] }
 0x193   :  { %v355_v25 = vadd.f32 %v343_v21, %v319_v23  ;;  %v352_v41 = vadd.f32 %v340_v33, %v316_v40  ;;  %v311_v21 = vmul.f32 %v299_v14, %v1098_v0  ;;  %v324_v0 = vld [vmem:[%s1324_s4 + $0x20] sm:$0xff] }
 0x194   :  { %v300_v33 = vld [vmem:[%s1323_s3 + $0x20] sm:$0xff] }
 0x195   :  { %v361_v28 = vpack.c.bf16 %v355_v25, %v354_v24 }
 0x197   :  { %v266_v34 = vpop.permute.xlu1 %265  ;;  %v214_v35 = vpop.permute.xlu0 %213  ;;  %v387_v36 = vsel %vm370_vm1, %v361_v28, 0 }
 0x198   :  { %v293_v37 = vsel %vm283_vm0, %v230_v7, %v266_v34  ;;  %395 = vmatpush.bf16.xpose.msra.mxu2 %v387_v36  ;;  %v285_v44 = vsel %vm283_vm0, %v214_v35, %v250_v30  ;;  %v313_v34 = vmul.f32 %v301_v57, %v1114_v5  ;;  %v312_v36 = vmul.f32 %v300_v33, %v1108_v3  ;;  %v302_v5 = vld [vmem:[%s1323_s3 + $0x30] sm:$0xff]  ;;  %v303_v3 = vld [vmem:[%s1323_s3 + $0x38] sm:$0xff] }
 0x199   :  { %v341_v39 = vmul.f32 %v329_v31, %v293_v37  ;;  %v333_v53 = vmul.f32 %v321_v43, %v285_v44  ;;  %v254_v12 = vpop.permute.xlu2 %253  ;;  %v327_v44 = vld [vmem:[%s1324_s4 + $0x38] sm:$0xff] }
 0x19b   :  { %v353_v42 = vadd.f32 %v341_v39, %v317_v38  ;;  %v345_v6 = vadd.f32 %v333_v53, %v309_v1  ;;  %v362_v1 = vld [vmem:[%s1325_s5] sm:$0xff] }
 0x19d   :  { %v360_v45 = vpack.c.bf16 %v353_v42, %v352_v41  ;;  %v326_v42 = vld [vmem:[%s1324_s4 + $0x30] sm:$0xff] }
 0x19f   :  { %v248_v56 = vpop.permute.xlu1 %247  ;;  %v1170_v59 = vpop.permute.xlu0 %171  ;;  %v384_v61 = vsel %vm370_vm1, %v360_v45, 0 }
 0x1a0   :  { %v284_v62 = vsel %vm283_vm0, %v212_v11, %v248_v56  ;;  %v193_v63 = vsub.f32 0.0, %v1170_v59  ;;  %396 = vmatpush.bf16.xpose.msra.mxu2 %v384_v61  ;;  %259 = vrot.lane.b32.xlu0 %v1170_v59, %s907_s16 }
 0x1a1   :  { %v332_v4 = vmul.f32 %v320_v51, %v284_v62  ;;  %v256_v28 = vpop.permute.xlu2 %255  ;;  %v314_v51 = vmul.f32 %v302_v5, %v1170_v59  ;;  %v363_v59 = vld [vmem:[%s1325_s5 + $0x8] sm:$0xff] }
 0x1a2   :  { %223 = vrot.lane.b32.xlu1 %v193_v63, %s906_s0 }
 0x1a3   :  { %v344_v7 = vadd.f32 %v332_v4, %v308_v2 }
 0x1a5   :  { %v356_v8 = vpack.c.bf16 %v345_v6, %v344_v7 }
 0x1a7   :  { %v174_v9 = vpop.permute.xlu1 %173  ;;  %758 = vmatmul.msk.bf16.vlgmr.msra.gmra.mxu2 %vm370_vm1, %v356_v8  ;;  %v218_v10 = vpop.permute.xlu0 %217 }
 0x1a8   :  { %v194_v11 = vsub.f32 0.0, %v174_v9  ;;  %v287_v54 = vsel %vm283_vm0, %v218_v10, %v254_v12  ;;  %v315_v53 = vmul.f32 %v303_v3, %v174_v9  ;;  %v364_v10 = vld [vmem:[%s1325_s5 + $0x10] sm:$0xff] }
 0x1a9   :  { %v335_v16 = vmul.f32 %v323_v49, %v287_v54  ;;  %v365_v54 = vld [vmem:[%s1325_s5 + $0x18] sm:$0xff] }
 0x1aa   :  { %225 = vrot.lane.b32.xlu2 %v194_v11, %s906_s0  ;;  %261 = vrot.lane.b32.xlu1 %v174_v9, %s907_s16 }
 0x1ab   :  { %v347_v23 = vadd.f32 %v335_v16, %v311_v21  ;;  %v366_v16 = vld [vmem:[%s1325_s5 + $0x20] sm:$0xff] }
 0x1af   :  { %v252_v17 = vpop.permute.xlu1 %251  ;;  %v220_v18 = vpop.permute.xlu0 %219 }
 0x1b0   :  { %v286_v19 = vsel %vm283_vm0, %v216_v47, %v252_v17  ;;  %v288_v31 = vsel %vm283_vm0, %v220_v18, %v256_v28 }
 0x1b1   :  { %v334_v22 = vmul.f32 %v322_v15, %v286_v19  ;;  %v336_v35 = vmul.f32 %v324_v0, %v288_v31 }
 0x1b3   :  { %v346_v24 = vadd.f32 %v334_v22, %v310_v20  ;;  %v348_v38 = vadd.f32 %v336_v35, %v312_v36  ;;  %v367_v20 = vld [vmem:[%s1325_s5 + $0x28] sm:$0xff] }
 0x1b5   :  { %v357_v25 = vpack.c.bf16 %v347_v23, %v346_v24 }
 0x1b7   :  { %v222_v26 = vpop.permute.xlu1 %221  ;;  %759 = vmatmul.msk.bf16.gmra.mxu2 %vm370_vm1, %v357_v25  ;;  %v258_v27 = vpop.permute.xlu0 %257 }
 0x1b8   :  { %v289_v30 = vsel %vm283_vm0, %v222_v26, %v258_v27  ;;  %v368_v27 = vld [vmem:[%s1325_s5 + $0x30] sm:$0xff] }
 0x1b9   :  { %v337_v32 = vmul.f32 %v325_v29, %v289_v30 }
 0x1bb   :  { %v349_v37 = vadd.f32 %v337_v32, %v313_v34  ;;  %v369_v34 = vld [vmem:[%s1325_s5 + $0x38] sm:$0xff] }
 0x1bd   :  { %v358_v39 = vpack.c.bf16 %v349_v37, %v348_v38 }
 0x1c7   :  { %760 = vmatmul.msk.bf16.gmra.mxu2 %vm370_vm1, %v358_v39 }
 0x204   :  { %v226_v45 = vpop.permute.xlu2 %225 }
 0x212   :  { %v260_v41 = vpop.permute.xlu0 %259 }
 0x214   :  { %v224_v40 = vpop.permute.xlu1 %223 }
 0x215   :  { %v290_v43 = vsel %vm283_vm0, %v224_v40, %v260_v41 }
 0x216   :  { %v338_v46 = vmul.f32 %v326_v42, %v290_v43 }
 0x218   :  { %v350_v61 = vadd.f32 %v338_v46, %v314_v51  ;;  %v185_v46 = vpack.c.bf16 %v1057_v52, %v1048_v50 }
 0x21c   :  { %v262_v47 = vpop.permute.xlu1 %261 }
 0x21d   :  { %v291_v48 = vsel %vm283_vm0, %v226_v45, %v262_v47 }
 0x21e   :  { %v339_v56 = vmul.f32 %v327_v44, %v291_v48 }
 0x220   :  { %v351_v62 = vadd.f32 %v339_v56, %v315_v53 }
 0x222   :  { %v359_v63 = vpack.c.bf16 %v351_v62, %v350_v61 }
 0x224   :  { %761 = vmatmul.msk.bf16.gmra.mxu2 %vm370_vm1, %v359_v63 }
 0x22a   :  { %v398_v2 = vpop.f32.mrf.mxu2 }
 0x22b   :  { %v399_v4 = vadd.f32 %v398_v2, %v362_v1 }
 0x22d   :  { %v418_v6 = vsel %vm370_vm1, %v399_v4, -inf }
 0x22e   :  { %419 = vmax.xlane.f32.xlu2 %v418_v6 }
 0x232   :  { %v400_v7 = vpop.f32.mrf.mxu2 }
 0x233   :  { %v401_v8 = vadd.f32 %v400_v7, %v363_v59 }
 0x235   :  { %v421_v9 = vsel %vm370_vm1, %v401_v8, -inf }
 0x236   :  { %422 = vmax.xlane.f32.xlu0 %v421_v9 }
 0x23a   :  { %v403_v11 = vpop.f32.mrf.mxu2 }
 0x23b   :  { %v404_v12 = vadd.f32 %v403_v11, %v364_v10 }
 0x23d   :  { %v424_v49 = vsel %vm370_vm1, %v404_v12, -inf }
 0x23e   :  { %425 = vmax.xlane.f32.xlu1 %v424_v49 }
 0x242   :  { %v405_v13 = vpop.f32.mrf.mxu2 }
 0x243   :  { %v406_v14 = vadd.f32 %v405_v13, %v365_v54 }
 0x245   :  { %v427_v15 = vsel %vm370_vm1, %v406_v14, -inf }
 0x246   :  { %428 = vmax.xlane.f32.xlu2 %v427_v15 }
 0x24a   :  { %v408_v17 = vpop.f32.mrf.mxu2 }
 0x24b   :  { %v409_v18 = vadd.f32 %v408_v17, %v366_v16 }
 0x24d   :  { %v430_v19 = vsel %vm370_vm1, %v409_v18, -inf }
 0x24e   :  { %431 = vmax.xlane.f32.xlu2 %v430_v19 }
 0x252   :  { %v410_v21 = vpop.f32.mrf.mxu2 }
 0x253   :  { %v411_v22 = vadd.f32 %v410_v21, %v367_v20 }
 0x255   :  { %v433_v23 = vsel %vm370_vm1, %v411_v22, -inf }
 0x256   :  { %434 = vmax.xlane.f32.xlu0 %v433_v23 }
 0x2a1   :  { %v420_v24 = vpop.xlane.xlu2 %419 }
 0x2a2   :  { %v442_v25 = vsub.f32 %v399_v4, %v420_v24 }
 0x2a4   :  { %v450_v26 = vmul.f32 1.442695, %v442_v25 }
 0x2a6   :  { %846 = vpow2.f32 %v450_v26 }
 0x2a7   :  { %v413_v28 = vpop.f32.mrf.mxu2 }
 0x2a8   :  { %v414_v29 = vadd.f32 %v413_v28, %v368_v27 }
 0x2a9   :  { %v423_v30 = vpop.xlane.xlu0 %422 }
 0x2aa   :  { %v443_v57 = vsub.f32 %v401_v8, %v423_v30  ;;  %v436_v0 = vsel %vm370_vm1, %v414_v29, -inf }
 0x2ab   :  { %437 = vmax.xlane.f32.xlu1 %v436_v0 }
 0x2ac   :  { %v1261_v31 = vpop.eup %846  ;;  %v452_v32 = vmul.f32 1.442695, %v443_v57 }
 0x2ad   :  { %v466_v33 = vsel %vm370_vm1, %v1261_v31, 0.0 }
 0x2ae   :  { %848 = vpow2.f32 %v452_v32  ;;  %467 = vadd.xlane.f32.xlu0 %v466_v33 }
 0x2af   :  { %v415_v35 = vpop.f32.mrf.mxu2 }
 0x2b0   :  { %v416_v36 = vadd.f32 %v415_v35, %v369_v34 }
 0x2b1   :  { %v426_v37 = vpop.xlane.xlu1 %425 }
 0x2b2   :  { %v444_v38 = vsub.f32 %v404_v12, %v426_v37  ;;  %v439_v39 = vsel %vm370_vm1, %v416_v36, -inf }
 0x2b3   :  { %440 = vmax.xlane.f32.xlu2 %v439_v39 }
 0x2b4   :  { %v849_v40 = vpop.eup %848  ;;  %v454_v41 = vmul.f32 1.442695, %v444_v38 }
 0x2b5   :  { %v469_v42 = vsel %vm370_vm1, %v849_v40, 0.0 }
 0x2b6   :  { %850 = vpow2.f32 %v454_v41  ;;  %470 = vadd.xlane.f32.xlu1 %v469_v42 }
 0x2b9   :  { %v429_v43 = vpop.xlane.xlu2 %428 }
 0x2ba   :  { %v445_v5 = vsub.f32 %v406_v14, %v429_v43 }
 0x2bc   :  { %v851_v3 = vpop.eup %850  ;;  %v456_v44 = vmul.f32 1.442695, %v445_v5 }
 0x2bd   :  { %v472_v45 = vsel %vm370_vm1, %v851_v3, 0.0 }
 0x2be   :  { %852 = vpow2.f32 %v456_v44  ;;  %473 = vadd.xlane.f32.xlu1 %v472_v45 }
 0x2c1   :  { %v432_v47 = vpop.xlane.xlu2 %431 }
 0x2c2   :  { %v446_v48 = vsub.f32 %v409_v18, %v432_v47  ;;  %512 = vrot.lane.b32.xlu0 %v185_v46, %s905_s1  ;;  %v822_v46 = vld [vmem:[%s1322_s2 + $0x38] sm:$0xff]  ;;  %v821_v47 = vld [vmem:[%s1322_s2 + $0x30] sm:$0xff] }
 0x2c3   :  { %656 = vmatpush.bf16.msrb.mxu0 %v822_v46 }
 0x2c4   :  { %v853_v51 = vpop.eup %852  ;;  %v458_v53 = vmul.f32 1.442695, %v446_v48  ;;  %v820_v48 = vld [vmem:[%s1322_s2 + $0x28] sm:$0xff] }
 0x2c5   :  { %v475_v56 = vsel %vm370_vm1, %v853_v51, 0.0 }
 0x2c6   :  { %854 = vpow2.f32 %v458_v53  ;;  %476 = vadd.xlane.f32.xlu1 %v475_v56  ;;  %v818_v53 = vld [vmem:[%s1322_s2 + $0x18] sm:$0xff]  ;;  %v817_v56 = vld [vmem:[%s1322_s2 + $0x10] sm:$0xff] }
 0x2c7   :  { %657 = vmatpush.bf16.msrb.mxu0 %v821_v47 }
 0x2c9   :  { %v435_v50 = vpop.xlane.xlu0 %434 }
 0x2ca   :  { %v447_v52 = vsub.f32 %v411_v22, %v435_v50 }
 0x2cb   :  { %514 = vrot.lane.b32.xlu2 %v186_v60, %s905_s1  ;;  %658 = vmatpush.bf16.msrb.mxu0 %v820_v48 }
 0x2cc   :  { %v855_v61 = vpop.eup %854  ;;  %v460_v63 = vmul.f32 1.442695, %v447_v52 }
 0x2cd   :  { %v478_v62 = vsel %vm370_vm1, %v855_v61, 0.0 }
 0x2ce   :  { %479 = vadd.xlane.f32.xlu1 %v478_v62  ;;  %856 = vpow2.f32 %v460_v63  ;;  %v815_v62 = vld [vmem:[%s1322_s2] sm:$0xff] }
 0x2d4   :  { %v857_v1 = vpop.eup %856 }
 0x2d5   :  { %v481_v2 = vsel %vm370_vm1, %v857_v1, 0.0 }
 0x2ec   :  { %482 = vadd.xlane.f32.xlu0 %v481_v2 }
 0x31e   :  { %v438_v4 = vpop.xlane.xlu1 %437 }
 0x31f   :  { %v448_v6 = vsub.f32 %v414_v29, %v438_v4 }
 0x321   :  { %v462_v59 = vmul.f32 1.442695, %v448_v6  ;;  %v468_v7 = vpop.xlane.xlu0 %467 }
 0x323   :  { %858 = vpow2.f32 %v462_v59 }
 0x324   :  { %860 = vrcp.f32 %v468_v7 }
 0x326   :  { %v441_v8 = vpop.xlane.xlu2 %440 }
 0x327   :  { %v449_v55 = vsub.f32 %v416_v36, %v441_v8 }
 0x329   :  { %v859_v58 = vpop.eup %858  ;;  %v464_v60 = vmul.f32 1.442695, %v449_v55  ;;  %v471_v9 = vpop.xlane.xlu1 %470 }
 0x32a   :  { %862 = vrcp.f32 %v471_v9  ;;  %v484_v10 = vsel %vm370_vm1, %v859_v58, 0.0  ;;  %v861_v12 = vpop.eup %860 }
 0x32b   :  { %864 = vpow2.f32 %v464_v60  ;;  %485 = vadd.xlane.f32.xlu2 %v484_v10  ;;  %v498_v17 = vmul.f32 %v861_v12, %v1261_v31 }
 0x32e   :  { %v515_v11 = vpop.permute.xlu2 %514 }
 0x32f   :  { %536 = vmatpush.bf16.msra.mxu3 %v515_v11 }
 0x330   :  { %v863_v49 = vpop.eup %862 }
 0x331   :  { %v865_v54 = vpop.eup %864  ;;  %v474_v13 = vpop.xlane.xlu1 %473  ;;  %v499_v15 = vmul.f32 %v863_v49, %v849_v40 }
 0x332   :  { %v487_v14 = vsel %vm370_vm1, %v865_v54, 0.0 }
 0x333   :  { %488 = vadd.xlane.f32.xlu1 %v487_v14  ;;  %v506_v18 = vpack.c.bf16 %v499_v15, %v498_v17 }
 0x334   :  { %v513_v16 = vpop.permute.xlu0 %512 }
 0x335   :  { %537 = vmatpush.bf16.msra.mxu3 %v513_v16 }
 0x338   :  { %762 = vmatmul.msk.bf16.vlgmr.msra.gmra.mxu3 %vm370_vm1, %v506_v18 }
 0x339   :  { %v477_v19 = vpop.xlane.xlu1 %476 }
 0x33a   :  { %866 = vrcp.f32 %v477_v19 }
 0x33b   :  { %868 = vrcp.f32 %v474_v13 }
 0x340   :  { %v867_v20 = vpop.eup %866 }
 0x341   :  { %v869_v21 = vpop.eup %868  ;;  %v501_v22 = vmul.f32 %v867_v20, %v853_v51  ;;  %v480_v25 = vpop.xlane.xlu1 %479  ;;  %v819_v51 = vld [vmem:[%s1322_s2 + $0x20] sm:$0xff] }
 0x342   :  { %v500_v23 = vmul.f32 %v869_v21, %v851_v3  ;;  %870 = vrcp.f32 %v480_v25  ;;  %659 = vmatpush.bf16.msrb.mxu0 %v819_v51 }
 0x344   :  { %v507_v24 = vpack.c.bf16 %v501_v22, %v500_v23 }
 0x346   :  { %660 = vmatpush.bf16.msrb.mxu0 %v818_v53 }
 0x348   :  { %763 = vmatmul.msk.bf16.gmra.mxu3 %vm370_vm1, %v507_v24  ;;  %v871_v27 = vpop.eup %870 }
 0x349   :  { %v502_v29 = vmul.f32 %v871_v27, %v855_v61  ;;  %v816_v61 = vld [vmem:[%s1322_s2 + $0x8] sm:$0xff]  ;;  %s909_s2 = smov [#allocation2]  }
 0x34a   :  { %661 = vmatpush.bf16.msrb.mxu0 %v817_v56  ;;  %s676_s23 = sshll.u32 %s909_s2, 4  ;;  %s677_s23 = int_to_ptr.vmem [resolvable:$true] %s676_s23 }
 0x34e   :  { %662 = vmatpush.bf16.msrb.mxu0 %v816_v61 }
 0x352   :  { %663 = vmatpush.bf16.msrb.mxu0 %v815_v62 }
 0x35f   :  { %v483_v26 = vpop.xlane.xlu0 %482 }
 0x360   :  { %872 = vrcp.f32 %v483_v26 }
 0x366   :  { %v873_v28 = vpop.eup %872 }
 0x367   :  { %v503_v30 = vmul.f32 %v873_v28, %v857_v1 }
 0x369   :  { %v508_v57 = vpack.c.bf16 %v503_v30, %v502_v29 }
 0x36b   :  { %764 = vmatmul.msk.bf16.gmra.mxu3 %vm370_vm1, %v508_v57 }
 0x39e   :  { %v486_v0 = vpop.xlane.xlu2 %485 }
 0x39f   :  { %874 = vrcp.f32 %v486_v0 }
 0x3a5   :  { %v875_v32 = vpop.eup %874 }
 0x3a6   :  { %v489_v31 = vpop.xlane.xlu1 %488  ;;  %v504_v34 = vmul.f32 %v875_v32, %v859_v58 }
 0x3a7   :  { %876 = vrcp.f32 %v489_v31 }
 0x3ad   :  { %v877_v33 = vpop.eup %876 }
 0x3ae   :  { %v505_v35 = vmul.f32 %v877_v33, %v865_v54 }
 0x3b0   :  { %v509_v36 = vpack.c.bf16 %v505_v35, %v504_v34 }
 0x3b2   :  { %765 = vmatmul.msk.bf16.gmra.mxu3 %vm370_vm1, %v509_v36 }
 0x3bb   :  { %v539_v37 = vpop.f32.mrf.mxu3 }
 0x3c3   :  { %v541_v38 = vpop.f32.mrf.mxu3 }
 0x3cb   :  { %v544_v39 = vpop.f32.mrf.mxu3 }
 0x3d3   :  { %v546_v40 = vpop.f32.mrf.mxu3 }
 0x3d4   :  { %v831_v41 = vpack.i.bf16 %v546_v40, %v544_v39 }
 0x3d6   :  { %832 = vrot.lane.b32.xlu1 %v831_v41, %s908_s17 }
 0x3ee   :  { %v549_v42 = vpop.f32.mrf.mxu3 }
 0x3f6   :  { %v551_v43 = vpop.f32.mrf.mxu3 }
 0x3f7   :  { %v836_v5 = vpack.i.bf16 %v551_v43, %v549_v42 }
 0x3f9   :  { %837 = vrot.lane.b32.xlu1 %v836_v5, %s905_s1 }
 0x435   :  { %v554_v3 = vpop.f32.mrf.mxu3 }
 0x43d   :  { %v556_v44 = vpop.f32.mrf.mxu3 }
 0x43e   :  { %v841_v45 = vpack.i.bf16 %v556_v44, %v554_v3 }
 0x440   :  { %842 = vrot.lane.b32.xlu0 %v841_v45, %s904_s15 }
 0x448   :  { %v833_v50 = vpop.permute.xlu1 %832 }
 0x449   :  { %v835_v63 = vunpack.i.h.bf16 %v833_v50  ;;  %v834_v1 = vunpack.i.l.bf16 %v833_v50 }
 0x44b   :  { %v584_v59 = vsel %vm370_vm1, %v541_v38, %v835_v63  ;;  %v583_v7 = vsel %vm370_vm1, %v539_v37, %v834_v1 }
 0x46b   :  { %v838_v52 = vpop.permute.xlu1 %837 }
 0x46c   :  { %v840_v2 = vunpack.i.h.bf16 %v838_v52  ;;  %v839_v4 = vunpack.i.l.bf16 %v838_v52 }
 0x46e   :  { %v587_v58 = vsel %vm585_vm2, %v584_v59, %v840_v2  ;;  %v586_v60 = vsel %vm585_vm2, %v583_v7, %v839_v4 }
 0x4b2   :  { %v843_v6 = vpop.permute.xlu0 %842 }
 0x4b3   :  { %v845_v8 = vunpack.i.h.bf16 %v843_v6  ;;  %v844_v55 = vunpack.i.l.bf16 %v843_v6 }
 0x4b5   :  { %v589_v9 = vsel %vm588_vm3, %v586_v60, %v844_v55  ;;  %v590_v10 = vsel %vm588_vm3, %v587_v58, %v845_v8 }
 0x4b6   :  { %v591_v11 = vpack.c.bf16 %v590_v10, %v589_v9 }
 0x4b8   :  { %664 = vmatmul.bf16.vlgmr.msrb.gmra.mxu0 %v591_v11 }
 0x535   :  { %v665_v12 = vpop.f32.mrf.mxu0 }
 0x536   :  { %670 = vst [vmem:[#allocation2] sm:$0xff] %v665_v12 }
 0x53d   :  { %v667_v49 = vpop.f32.mrf.mxu0 }
 0x53e   :  { %671 = vst [vmem:[#allocation2 + $0x8] sm:$0xff] %v667_v49 }
 0x53f   :  { %684 = dma.vmem_to_hbm [thread:$0]  %s677_s23, 256, %s679_s26, [#allocation3], %s910_s27, %s910_s27, %s911_s28  }
 0x540   :  { %902 = dma.done.wait [#allocation3], 256  }
 0x541   :  { %903 = vsyncadd [#allocation3], 4294967040 }
 0x542   :  { %689 = vsyncpa [#allocation3], 1 }

</bundles_post_ra>
